<compile_context>
chip_gen: v6e
topology: v6e:2x2x1
jax: 0.10.0
libtpu: 0.0.40
codegen_flags: <defaults>
</compile_context>

<pallas_src>
import functools

import jax
import jax.numpy as jnp
from jax.experimental import pallas as pl
from jax.experimental.pallas import tpu as pltpu


def _round_up(x, m):
    return (x + m - 1) // m * m


def _label_smoothing_kernel(pred_ref, target_ref, out_ref, *,
                            classes, smoothing, confidence, n_rows, row_tile,
                            mask_remainder):
    i = pl.program_id(0)

    p = pred_ref[...]                               # (TN, C) in HBM dtype
    tgt = target_ref[...]                           # (TN, 1) int32
    tn, c = p.shape

    smooth_val = smoothing / (classes - 1)

    # Numerically stable log-sum-exp per row, in f32 (exp/log go to the EUP).
    x = p.astype(jnp.float32)                       # (TN, C)
    row_max = jnp.max(x, axis=-1, keepdims=True)                    # (TN, 1)
    sum_exp = jnp.sum(jnp.exp(x - row_max), axis=-1, keepdims=True)
    lse = row_max + jnp.log(sum_exp)                                 # (TN, 1)

    # Fused weighted reduction (weights sum to exactly 1 across classes):
    #   loss_i = lse_i - sum_c( w_{i,c} * pred_{i,c} )
    class_ids = jax.lax.broadcasted_iota(jnp.int32, (tn, c), 1)      # (TN, C)
    w = jnp.where(class_ids == tgt, confidence, smooth_val)          # (TN, C) f32
    weighted = jnp.sum(w * x, axis=-1, keepdims=True)                # (TN, 1)
    per_row = lse - weighted                                         # (TN, 1)

    if mask_remainder:
        # Only the ragged last tile needs this; generated only when N % TN != 0.
        row_ids = i * row_tile + jax.lax.broadcasted_iota(jnp.int32, (tn, 1), 0)
        per_row = jnp.where(row_ids < n_rows, per_row, 0.0)          # select, not mul

    tile_sum = jnp.sum(per_row)
    # Broadcast the scalar partial into this tile's private (8, 128) block
    # (lane-dense unmasked store; reduced once on the host side).
    out_ref[...] = jnp.full(out_ref.shape, tile_sum, dtype=jnp.float32)


def label_smoothing_loss(pred, target, *, classes, smoothing=0.0, row_tile=None):
    """pred: (N, classes) float (f32 or bf16); target: (N,) int. Scalar f32 loss."""
    n, c = pred.shape
    assert c == classes
    assert classes > 1, "label smoothing needs classes > 1 (smoothing/(C-1))"
    confidence = 1.0 - smoothing

    itemsize = jnp.dtype(pred.dtype).itemsize
    # Sublane packing granularity by dtype width: f32 -> 8, bf16 -> 16, 8-bit -> 32.
    sub = {4: 8, 2: 16, 1: 32}.get(itemsize, 8)

    # Per-generation VMEM working-set budget (well under every default scoped
    # limit: v5e 16 MiB, v6e/v7x 32 MiB; v7x physical is only 64 MiB).
    try:
        info = pltpu.get_tpu_info()
        vmem_cap = int(getattr(info, "vmem_capacity_bytes", 64 * 1024 * 1024))
    except Exception:  # no TPU info available at trace time -> be conservative
        vmem_cap = 64 * 1024 * 1024
    budget = max(2 * 1024 * 1024, min(vmem_cap // 8, 8 * 1024 * 1024))

    # Total in-kernel footprint per row:
    #   2x double-buffered streamed tile (HBM dtype) + ~4 full-width f32
    #   intermediates (upcast copy, exp, weights/iota, product).
    bytes_per_row = 2 * c * itemsize + 4 * c * 4
    tn_cap = max(sub, (budget // bytes_per_row) // sub * sub)

    tn = min(_round_up(n, sub), tn_cap)
    # Prefer >= 2 row tiles when N allows, so megacore (v7x) can split the grid.
    if n >= 2 * sub:
        tn = min(tn, _round_up(pl.cdiv(n, 2), sub))
    if row_tile is not None:
        tn = min(tn, max(sub, (int(row_tile) // sub) * sub))
    tn = max(sub, tn)
    num_tiles = pl.cdiv(n, tn)
    mask_remainder = (n % tn) != 0

    target2d = target.astype(jnp.int32).reshape(n, 1)

    kernel = functools.partial(
        _label_smoothing_kernel,
        classes=classes,
        smoothing=float(smoothing),
        confidence=float(confidence),
        n_rows=n,
        row_tile=tn,
        mask_remainder=mask_remainder,
    )

    partials = pl.pallas_call(
        kernel,
        out_shape=jax.ShapeDtypeStruct((num_tiles * 8, 128), jnp.float32),
        grid_spec=pltpu.PrefetchScalarGridSpec(
            num_scalar_prefetch=0,
            grid=(num_tiles,),
            in_specs=[
                pl.BlockSpec((tn, c), lambda i: (i, 0)),   # streamed logits tile
                pl.BlockSpec((tn, 1), lambda i: (i, 0)),   # matching target rows
            ],
            out_specs=pl.BlockSpec((8, 128), lambda i: (i, 0)),
        ),
        compiler_params=pltpu.CompilerParams(
            dimension_semantics=("parallel",),   # independent row tiles -> megacore
        ),
    )(pred, target2d)

    # Each tile wrote its partial sum broadcast over its own (8, 128) block,
    # so a single dense sum over-counts by exactly 8*128.
    return jnp.sum(partials) / (8.0 * 128.0 * n)


def _reference(pred, target, *, classes, smoothing):
    confidence = 1.0 - smoothing
    logp = jax.nn.log_softmax(pred.astype(jnp.float32), axis=-1)
    true_dist = jnp.full_like(logp, smoothing / (classes - 1))
    true_dist = true_dist.at[jnp.arange(pred.shape[0]), target].set(confidence)
    return jnp.mean(jnp.sum(-true_dist * logp, axis=-1))


if __name__ == "__main__":
    smoothing = 0.1
    key = jax.random.PRNGKey(0)
    k1, k2, k3, k4, k5, k6 = jax.random.split(key, 6)

    # Case 1: small, single-tile, f32.
    N, C = 8, 16
    pred = jax.random.normal(k1, (N, C), dtype=jnp.float32)
    target = jax.random.randint(k2, (N,), 0, C, dtype=jnp.int32)
    loss = jax.block_until_ready(
        label_smoothing_loss(pred, target, classes=C, smoothing=smoothing))
    ref = _reference(pred, target, classes=C, smoothing=smoothing)
    assert jnp.allclose(loss, ref, atol=1e-5, rtol=1e-5), (loss, ref)

    # Case 2: multi-tile with a remainder tile (exercises pipelining + masking).
    N2, C2 = 20, 16
    pred2 = jax.random.normal(k3, (N2, C2), dtype=jnp.float32)
    target2 = jax.random.randint(k4, (N2,), 0, C2, dtype=jnp.int32)
    loss2 = jax.block_until_ready(
        label_smoothing_loss(pred2, target2, classes=C2, smoothing=smoothing,
                             row_tile=8))
    ref2 = _reference(pred2, target2, classes=C2, smoothing=smoothing)
    assert jnp.allclose(loss2, ref2, atol=1e-5, rtol=1e-5), (loss2, ref2)

    # Case 3: bf16 logits, multi-tile (exercises the 16-sublane bf16 path).
    N3, C3 = 32, 128
    pred3 = jax.random.normal(k5, (N3, C3), dtype=jnp.float32).astype(jnp.bfloat16)
    target3 = jax.random.randint(k6, (N3,), 0, C3, dtype=jnp.int32)
    loss3 = jax.block_until_ready(
        label_smoothing_loss(pred3, target3, classes=C3, smoothing=smoothing))
    ref3 = _reference(pred3, target3, classes=C3, smoothing=smoothing)
    assert jnp.allclose(loss3, ref3, atol=1e-4, rtol=1e-4), (loss3, ref3)

    print("KERNEL_OK")
</pallas_src>

<mosaic_0001>
module attributes {stable_mosaic.version = 11 : i64} {
  func.func @_label_smoothing_kernel(%arg0: i32, %arg1: memref<8x16xf32, #tpu.memory_space<vmem>>, %arg2: memref<8x1xi32, #tpu.memory_space<vmem>>, %arg3: memref<8x128xf32, #tpu.memory_space<vmem>>) attributes {dimension_semantics = [#tpu.dimension_semantics<parallel>], iteration_bounds = array<i64: 1>, scalar_prefetch = 0 : i64, scratch_operands = 0 : i64, tpu.core_type = #tpu.core_type<tc>, window_params = [{transform_indices = @transform_0, window_bounds = array<i64: 8, 16>}, {transform_indices = @transform_1, window_bounds = array<i64: 8, 1>}, {transform_indices = @transform_2, window_bounds = array<i64: 8, 128>}]} {
    %c0 = arith.constant 0 : index
    %c0_0 = arith.constant 0 : index
    %0 = vector.load %arg1[%c0, %c0_0] : memref<8x16xf32, #tpu.memory_space<vmem>>, vector<8x16xf32>
    %c0_1 = arith.constant 0 : index
    %c0_2 = arith.constant 0 : index
    %1 = vector.load %arg2[%c0_1, %c0_2] : memref<8x1xi32, #tpu.memory_space<vmem>>, vector<8x1xi32>
    %cst = arith.constant dense<0xFF800000> : vector<8xf32>
    %2 = vector.multi_reduction <maximumf>, %0, %cst [1] : vector<8x16xf32> to vector<8xf32>
    %3 = vector.shape_cast %2 : vector<8xf32> to vector<8x1xf32>
    %4 = vector.broadcast %3 : vector<8x1xf32> to vector<8x16xf32>
    %5 = arith.subf %0, %4 : vector<8x16xf32>
    %6 = math.exp %5 : vector<8x16xf32>
    %cst_3 = arith.constant dense<0.000000e+00> : vector<8xf32>
    %7 = vector.multi_reduction <add>, %6, %cst_3 [1] : vector<8x16xf32> to vector<8xf32>
    %8 = vector.shape_cast %7 : vector<8xf32> to vector<8x1xf32>
    %9 = math.log %8 : vector<8x1xf32>
    %10 = arith.addf %3, %9 : vector<8x1xf32>
    %11 = tpu.iota {dimensions = array<i32: 1>} : vector<8x16xi32>
    %12 = vector.broadcast %1 : vector<8x1xi32> to vector<8x16xi32>
    %13 = arith.cmpi eq, %11, %12 : vector<8x16xi32>
    %cst_4 = arith.constant 0.899999976 : f32
    %cst_5 = arith.constant 0.00666666683 : f32
    %14 = vector.broadcast %cst_4 : f32 to vector<8x16xf32>
    %15 = vector.broadcast %cst_5 : f32 to vector<8x16xf32>
    %16 = arith.select %13, %14, %15 : vector<8x16xi1>, vector<8x16xf32>
    %17 = arith.mulf %16, %0 : vector<8x16xf32>
    %cst_6 = arith.constant dense<0.000000e+00> : vector<8xf32>
    %18 = vector.multi_reduction <add>, %17, %cst_6 [1] : vector<8x16xf32> to vector<8xf32>
    %19 = vector.shape_cast %18 : vector<8xf32> to vector<8x1xf32>
    %20 = arith.subf %10, %19 : vector<8x1xf32>
    %21 = vector.shape_cast %20 : vector<8x1xf32> to vector<1x8x1xf32>
    %cst_7 = arith.constant dense<0.000000e+00> : vector<1xf32>
    %22 = vector.multi_reduction <add>, %21, %cst_7 [1, 2] : vector<1x8x1xf32> to vector<1xf32>
    %23 = vector.shape_cast %22 : vector<1xf32> to vector<1x1x1xf32>
    %24 = vector.extract %23[0, 0, 0] : f32 from vector<1x1x1xf32>
    %25 = vector.broadcast %24 : f32 to vector<8x128xf32>
    %c0_8 = arith.constant 0 : index
    %c0_9 = arith.constant 0 : index
    %26 = vector.load %arg3[%c0_8, %c0_9] : memref<8x128xf32, #tpu.memory_space<vmem>>, vector<8x128xf32>
    tpu.vector_store %arg3[%c0_8, %c0_9], %25 {strides = array<i32>} : memref<8x128xf32, #tpu.memory_space<vmem>>, vector<8x128xf32>,
    return
  }
  func.func @transform_0(%arg0: i32) -> (i32, i32) {
    %c0_i32 = arith.constant 0 : i32
    %c0_i32_0 = arith.constant 0 : i32
    return %arg0, %c0_i32 : i32, i32
  }
  func.func @transform_1(%arg0: i32) -> (i32, i32) {
    %c0_i32 = arith.constant 0 : i32
    %c0_i32_0 = arith.constant 0 : i32
    return %arg0, %c0_i32 : i32, i32
  }
  func.func @transform_2(%arg0: i32) -> (i32, i32) {
    %c0_i32 = arith.constant 0 : i32
    %c0_i32_0 = arith.constant 0 : i32
    return %arg0, %c0_i32 : i32, i32
  }
}

</mosaic_0001>

<bundles_post_ra>
// kernel: tpu_custom_call.1
= control target key start
LH: loop header
LB: loop body
LE: loop exit
PB: predicated region body
PF: predicated region fallthrough
CT: control target
= control target key end

     0   :  { %vm14_vm0 = vcmask 130048   ;;  %s128_s0 = inlined_call_operand.vmem [shape: f32[8,16], index: 0, kind: input, shape index: {}]   ;;  %s129_s1 = inlined_call_operand.vmem [shape: s32[8,1], index: 1, kind: input, shape index: {}]   ;;  %s130_s2 = inlined_call_operand.hbm [shape: f32[8,128], index: 2, kind: output, shape index: {}]  }
   0x1   :  { %v12_v0 = vld [vmem:[%s128_s0] sm:$0xff] }
   0x2   :  { %7 = vsyncpa [#allocation3], 0  ;;  %v15_v1 = vsel %vm14_vm0, %v12_v0, -inf  ;;  %v98_v2 = vmov 0   ;;  %v13_v3 = vld [vmem:[%s129_s1] sm:$0xff]  ;;  %v27_v7 = vlaneseq  ;;  %vm39_vm2 = vcmask 7168  }
   0x3   :  { %71 = vset.pattern.permute.xlu0 %v98_v2  ;;  %v99_v10 = vmov 0.006666667   ;;  %s100_s0 = smov [#allocation2]  }
   0x4   :  { %16 = vmax.xlane.f32.xlu0 %v15_v1  ;;  %v28_v8 = vand.u32 127, %v27_v7  ;;  %s58_s1 = sshll.u32 %s100_s0, 4  ;;  %s59_s1 = int_to_ptr.vmem [resolvable:$true] %s58_s1 }
   0x5   :  { %s76_s14 = scalar_lea.vmem %s59_s1, 128  ;;  %p81_p1 = scmp.lt.s32.totalorder %s59_s1, %s59_s1 }
   0x6   :  { %p77_p0 = scmp.ne.s32.totalorder %s59_s1, %s76_s14  ;;  %p82_p2 = scmp.lt.s32.totalorder %s76_s14, %s76_s14 }
   0x8   :  { %p83_p3 = por %p82_p2, %p81_p1 }
   0xa   :  { %p84_p4 = pnand %p83_p3, %p77_p0 }
  0x1a   :  { %30 = vperm.xlu0 %71, %v13_v3  }
  0x8d   :  { %v17_v4 = vpop.xlane.xlu0 %16 }
  0x8e   :  { %v18_v5 = vsub.f32 %v12_v0, %v17_v4 }
  0x90   :  { %v19_v6 = vmul.f32 1.442695, %v18_v5 }
  0x92   :  { %72 = vpow2.f32 %v19_v6 }
  0x95   :  { %v31_v9 = vpop.permute.xlu0 %30 }
  0x96   :  { %vm32_vm1 = vcmp.eq.s32.totalorder %v28_v8, %v31_v9 }
  0x97   :  { %v33_v11 = vsel %vm32_vm1, 0.9, %v99_v10 }
  0x98   :  { %v34_v12 = vmul.f32 %v33_v11, %v12_v0 }
  0x9a   :  { %v35_v15 = vsel %vm14_vm0, %v34_v12, 0.0 }
  0x9f   :  { %v73_v13 = vpop.eup %72 }
  0xa0   :  { %v21_v14 = vsel %vm14_vm0, %v73_v13, 0.0 }
  0xa1   :  { %22 = vadd.xlane.f32.xlu1 %v21_v14 }
  0xa5   :  { %36 = vadd.xlane.f32.xlu1 %v35_v15 }
 0x12a   :  { %v23_v16 = vpop.xlane.xlu1 %22 }
 0x12b   :  { %74 = vlog2.f32 %v23_v16 }
 0x12e   :  { %v37_v19 = vpop.xlane.xlu1 %36 }
 0x138   :  { %v75_v17 = vpop.eup %74 }
 0x139   :  { %v25_v18 = vmul.f32 0.6931472, %v75_v17 }
 0x13b   :  { %v26_v20 = vadd.f32 %v25_v18, %v17_v4 }
 0x13d   :  { %v38_v21 = vsub.f32 %v26_v20, %v37_v19 }
 0x13f   :  { %v40_v22 = vsel %vm39_vm2, %v38_v21, 0.0 }
 0x140   :  { %41 = vadd.xlane.f32.xlu1 %v40_v22 }
 0x1c9   :  { %v42_v23 = vpop.xlane.xlu1 %41 }
 0x1ca   :  { %v43_v24 = vrot.slane %v42_v23, 4 }
 0x1cc   :  { %v44_v25 = vadd.f32 %v43_v24, %v42_v23 }
 0x1ce   :  { %v45_v26 = vrot.slane %v44_v25, 2 }
 0x1d0   :  { %v46_v27 = vadd.f32 %v45_v26, %v44_v25 }
 0x1d2   :  { %v47_v28 = vrot.slane %v46_v27, 1 }
 0x1d4   :  { %v48_v29 = vadd.f32 %v47_v28, %v46_v27 }
 0x1d6   :  { %66 = vpush %v48_v29 }
 0x207   :  { %s67_s13 = spop %66 }
 0x208   :  { %v50_v30 = vstv %s67_s13 }
 0x209   :  { %51 = vst [vmem:[#allocation2] sm:$0xff] %v50_v30 }
 0x20a   :  { %87 = shalt.err (!%p84_p4)
}
 0x20b   :  { %61 = dma.vmem_to_hbm [thread:$0]  %s59_s1, 128, %s130_s2, [#allocation3]  }
 0x20c   :  { %96 = dma.done.wait [#allocation3], 128  }
 0x20d   :  { %97 = vsyncadd [#allocation3], 4294967168 }
 0x20e   :  { %65 = vsyncpa [#allocation3], 1 }

</bundles_post_ra>
